<compile_context>
chip_gen: v7x
topology: tpu7x:2x2x1
jax: 0.10.0
libtpu: 0.0.40
codegen_flags: <defaults>
</compile_context>

<pallas_src>
import functools

import jax
import jax.numpy as jnp
from jax import lax
from jax.experimental import pallas as pl
from jax.experimental.pallas import tpu as pltpu

_LANE = 128
_EPS = 1e-12  # torch.nn.functional.normalize default eps


def _round_up(v, m):
    return -(-v // m) * m


# ----------------------------------------------------------------------------
# Kernels
# ----------------------------------------------------------------------------
def _hard_memory_rows_kernel(m_real, x_ref, mnt_ref, mem_ref, o_ref):
    # x_ref:   (TN, D)   tile of input rows (NOT normalized; argmax is scale-invariant)
    # mnt_ref: (D,  Mp)  pre-normalized memory, pre-transposed (resident, computed once)
    # mem_ref: (Mp, D)   raw memory, zero-padded rows (resident)
    # o_ref:   (TN, D)   selected (exact) memory rows
    x = x_ref[...].astype(jnp.float32)

    # cosine-similarity ordering on the MXU: (TN, D) @ (D, Mp) -> (TN, Mp)
    sim = jnp.dot(x, mnt_ref[...], preferred_element_type=jnp.float32)

    mp = sim.shape[-1]
    col = lax.broadcasted_iota(jnp.int32, sim.shape, 1)          # (TN, Mp)
    sim = jnp.where(col < m_real, sim, -jnp.inf)                 # mask lane padding

    # argmax along memory axis, first-occurrence tie-break
    max_val = jnp.max(sim, axis=-1, keepdims=True)               # (TN, 1)
    masked_idx = jnp.where(sim == max_val, col, mp)
    arg = jnp.min(masked_idx, axis=-1, keepdims=True)            # (TN, 1)

    # gather memory[arg] via one-hot matmul (exact rows: 1.0*row + 0.0*rest)
    one_hot = (col == arg).astype(jnp.float32)                   # (TN, Mp)
    sel = jnp.dot(one_hot, mem_ref[...], preferred_element_type=jnp.float32)
    o_ref[...] = sel.astype(o_ref.dtype)


def _hard_memory_cols_kernel(m_real, x_ref, mn_ref, memt_ref, o_ref):
    # x_ref:    (1, C, T)  NCHW column block (C == mem_dim, T spatial positions)
    # mn_ref:   (Mp, C)    pre-normalized memory (resident)
    # memt_ref: (C, Mp)    raw memory transposed (resident)
    # o_ref:    (1, C, T)  selected memory rows, written channels-first (no relayout)
    x = x_ref[0].astype(jnp.float32)                             # (C, T)

    # sim over memory axis in the sublanes: (Mp, C) @ (C, T) -> (Mp, T)
    sim = jnp.dot(mn_ref[...], x, preferred_element_type=jnp.float32)

    mp = sim.shape[0]
    row = lax.broadcasted_iota(jnp.int32, sim.shape, 0)          # (Mp, T)
    sim = jnp.where(row < m_real, sim, -jnp.inf)                 # mask padded memory rows

    max_val = jnp.max(sim, axis=0, keepdims=True)                # (1, T)
    masked_idx = jnp.where(sim == max_val, row, mp)
    arg = jnp.min(masked_idx, axis=0, keepdims=True)             # (1, T)

    one_hot = (row == arg).astype(jnp.float32)                   # (Mp, T)
    sel = jnp.dot(memt_ref[...], one_hot, preferred_element_type=jnp.float32)  # (C, T)
    o_ref[0] = sel.astype(o_ref.dtype)


# ----------------------------------------------------------------------------
# Wrappers
# ----------------------------------------------------------------------------
def _prep_memory(memory):
    """Hoisted, done once per call on a tiny (M, D) array: normalize rows and
    lane-pad M to a multiple of 128 (zeros; masked out in the kernel argmax)."""
    M, D = memory.shape
    mem_f32 = memory.astype(jnp.float32)
    m_norm = mem_f32 / jnp.maximum(
        jnp.sqrt(jnp.sum(mem_f32 * mem_f32, axis=-1, keepdims=True)), _EPS)
    m_pad = _round_up(M, _LANE)
    if m_pad != M:
        mem_f32 = jnp.pad(mem_f32, ((0, m_pad - M), (0, 0)))
        m_norm = jnp.pad(m_norm, ((0, m_pad - M), (0, 0)))
    return mem_f32, m_norm, m_pad


def _pick_tile_n(n_rows):
    """Row tile: as large as useful (cap 512), multiple of 8, and giving >=2 grid
    steps when there is enough work (v7x has 2 TensorCores on the parallel axis)."""
    n8 = _round_up(n_rows, 8)
    if n8 <= 16:
        return n8
    if n8 <= 1024:
        return min(512, _round_up(n8 // 2, 8))
    return 512


def _pick_hw_tile(hw):
    """Spatial tile for the NCHW kernel: lane-dense multiple of 128 when possible,
    otherwise the full extent (always a legal block shape)."""
    if hw % _LANE == 0:
        for cand in (512, 256, 128):
            if hw % cand == 0:
                return cand
    return hw


def _hard_memory_rows(x_rows, memory):
    """x_rows: (N, D); memory: (M, D) -> (N, D) selected memory rows."""
    N, D = x_rows.shape
    M, Dm = memory.shape
    assert D == Dm, "feature dim must equal mem_dim"

    mem_p, mnorm_p, m_pad = _prep_memory(memory)
    mnt = mnorm_p.T                                   # (D, Mp) MXU-native RHS

    tile_n = _pick_tile_n(N)
    n_pad = (-N) % tile_n
    if n_pad:
        x_rows = jnp.concatenate(
            [x_rows, jnp.zeros((n_pad, D), x_rows.dtype)], axis=0)
    Np = x_rows.shape[0]

    cost = pl.CostEstimate(
        flops=4 * Np * m_pad * D,                     # two matmuls
        transcendentals=0,
        bytes_accessed=2 * Np * D * 4 + 2 * m_pad * D * 4)

    out = pl.pallas_call(
        functools.partial(_hard_memory_rows_kernel, M),
        out_shape=jax.ShapeDtypeStruct((Np, D), memory.dtype),
        grid_spec=pltpu.PrefetchScalarGridSpec(
            num_scalar_prefetch=0,
            grid=(Np // tile_n,),
            in_specs=[
                pl.BlockSpec((tile_n, D), lambda i: (i, 0)),    # x tile
                pl.BlockSpec((D, m_pad), lambda i: (0, 0)),     # normalized mem^T (resident)
                pl.BlockSpec((m_pad, D), lambda i: (0, 0)),     # raw mem (resident)
            ],
            out_specs=pl.BlockSpec((tile_n, D), lambda i: (i, 0)),
        ),
        compiler_params=pltpu.CompilerParams(
            dimension_semantics=("parallel",)),
        cost_estimate=cost,
    )(x_rows, mnt, mem_p)

    return out[:N]


def _hard_memory_nchw(x, memory):
    """x: (B, C, H, W) NCHW with C == mem_dim -> same shape, no wrapper transposes."""
    B, C, H, W = x.shape
    M, D = memory.shape
    assert C == D, "channel dim must equal mem_dim"
    HW = H * W

    mem_p, mnorm_p, m_pad = _prep_memory(memory)
    memt = mem_p.T                                    # (C, Mp)

    x3 = x.reshape(B, C, HW)                          # contiguous view, no relayout
    t_hw = _pick_hw_tile(HW)

    cost = pl.CostEstimate(
        flops=4 * B * HW * m_pad * C,
        transcendentals=0,
        bytes_accessed=2 * B * C * HW * 4 + 2 * m_pad * C * 4)

    out = pl.pallas_call(
        functools.partial(_hard_memory_cols_kernel, M),
        out_shape=jax.ShapeDtypeStruct((B, C, HW), memory.dtype),
        grid_spec=pltpu.PrefetchScalarGridSpec(
            num_scalar_prefetch=0,
            grid=(B, HW // t_hw),
            in_specs=[
                pl.BlockSpec((1, C, t_hw), lambda b, j: (b, 0, j)),  # x column block
                pl.BlockSpec((m_pad, C), lambda b, j: (0, 0)),       # normalized mem
                pl.BlockSpec((C, m_pad), lambda b, j: (0, 0)),       # raw mem^T
            ],
            out_specs=pl.BlockSpec((1, C, t_hw), lambda b, j: (b, 0, j)),
        ),
        compiler_params=pltpu.CompilerParams(
            dimension_semantics=("parallel", "parallel")),
        cost_estimate=cost,
    )(x3, mnorm_p, memt)

    return out.reshape(B, C, H, W)


def hard_memory_forward(x, memory):
    """Replicates HardMemory.forward for 2D (N, D) or 4D NCHW (B, C, H, W) inputs."""
    if x.ndim == 2:
        return _hard_memory_rows(x, memory)
    if x.ndim == 4:
        return _hard_memory_nchw(x, memory)
    raise ValueError("Unsupported input shape for HardMemory")


# ----------------------------------------------------------------------------
# Plain-JAX reference (mirrors the PyTorch module) for verification
# ----------------------------------------------------------------------------
def _reference_forward(x, memory):
    def norm(v):
        return v / jnp.maximum(jnp.linalg.norm(v, axis=-1, keepdims=True), _EPS)
    if x.ndim == 2:
        sim = norm(x) @ norm(memory).T
        return memory[jnp.argmax(sim, axis=1)]
    B, C, H, W = x.shape
    x_flat = jnp.transpose(x.reshape(B, C, H * W), (0, 2, 1))
    sim = norm(x_flat) @ norm(memory).T
    sel = memory[jnp.argmax(sim, axis=-1)]
    return jnp.transpose(sel, (0, 2, 1)).reshape(B, C, H, W)


if __name__ == "__main__":
    mem_size, mem_dim = 100, 128  # module defaults

    key = jax.random.PRNGKey(0)
    k_mem, k_x4, k_x2, k_x2b = jax.random.split(key, 4)

    # deterministic "parameter" init (torch.randn equivalent)
    memory = jax.random.normal(k_mem, (mem_size, mem_dim), dtype=jnp.float32)

    # 4D NCHW input: B=2, C=mem_dim=128, H=W=16 (HW=256 -> lane-dense column tiles)
    x4 = jax.random.normal(k_x4, (2, mem_dim, 16, 16), dtype=jnp.float32)
    # 2D inputs: tiny (8, D) and a larger (200, D) that exercises row tiling + padding
    x2 = jax.random.normal(k_x2, (8, mem_dim), dtype=jnp.float32)
    x2b = jax.random.normal(k_x2b, (200, mem_dim), dtype=jnp.float32)

    out4 = jax.block_until_ready(hard_memory_forward(x4, memory))
    out2 = jax.block_until_ready(hard_memory_forward(x2, memory))
    out2b = jax.block_until_ready(hard_memory_forward(x2b, memory))

    ref4 = _reference_forward(x4, memory)
    ref2 = _reference_forward(x2, memory)
    ref2b = _reference_forward(x2b, memory)

    assert out4.shape == x4.shape and out2.shape == x2.shape and out2b.shape == x2b.shape
    assert jnp.allclose(out4, ref4, atol=1e-5), "4D mismatch vs reference"
    assert jnp.allclose(out2, ref2, atol=1e-5), "2D mismatch vs reference"
    assert jnp.allclose(out2b, ref2b, atol=1e-5), "2D (tiled) mismatch vs reference"

    print("KERNEL_OK")
</pallas_src>

<mosaic_0001>
module attributes {stable_mosaic.version = 11 : i64} {
  func.func @_hard_memory_cols_kernel(%arg0: i32, %arg1: i32, %arg2: memref<1x128x256xf32, #tpu.memory_space<vmem>>, %arg3: memref<128x128xf32, #tpu.memory_space<vmem>>, %arg4: memref<128x128xf32, #tpu.memory_space<vmem>>, %arg5: memref<1x128x256xf32, #tpu.memory_space<vmem>>) attributes {dimension_semantics = [#tpu.dimension_semantics<parallel>, #tpu.dimension_semantics<parallel>], iteration_bounds = array<i64: 2, 1>, scalar_prefetch = 0 : i64, scratch_operands = 0 : i64, tpu.core_type = #tpu.core_type<tc>, window_params = [{transform_indices = @transform_0, window_bounds = array<i64: 1, 128, 256>}, {pipeline_mode = #tpu.pipeline_mode<synchronous>, transform_indices = @transform_1, window_bounds = array<i64: 128, 128>}, {pipeline_mode = #tpu.pipeline_mode<synchronous>, transform_indices = @transform_2, window_bounds = array<i64: 128, 128>}, {transform_indices = @transform_3, window_bounds = array<i64: 1, 128, 256>}]} {
    %c0 = arith.constant 0 : index
    %c0_0 = arith.constant 0 : index
    %c0_1 = arith.constant 0 : index
    %0 = vector.load %arg2[%c0, %c0_0, %c0_1] : memref<1x128x256xf32, #tpu.memory_space<vmem>>, vector<1x128x256xf32>
    %1 = vector.shape_cast %0 : vector<1x128x256xf32> to vector<128x256xf32>
    %c0_2 = arith.constant 0 : index
    %c0_3 = arith.constant 0 : index
    %2 = vector.load %arg3[%c0_2, %c0_3] : memref<128x128xf32, #tpu.memory_space<vmem>>, vector<128x128xf32>
    %cst = arith.constant dense<0.000000e+00> : vector<128x256xf32>
    %3 = tpu.matmul %2, %1, %cst {dimension_numbers = #tpu.dot_dimension_numbers<[1], [0], [0], [1], [0, 0, 1, 1], [], []>} : vector<128x128xf32>, vector<128x256xf32>, vector<128x256xf32> -> vector<128x256xf32>
    %4 = tpu.iota {dimensions = array<i32: 0>} : vector<128x256xi32>
    %c100_i32 = arith.constant 100 : i32
    %5 = vector.broadcast %c100_i32 : i32 to vector<128x256xi32>
    %6 = arith.cmpi slt, %4, %5 : vector<128x256xi32>
    %cst_4 = arith.constant 0xFF800000 : f32
    %7 = vector.broadcast %cst_4 : f32 to vector<128x256xf32>
    %8 = arith.select %6, %3, %7 : vector<128x256xi1>, vector<128x256xf32>
    %cst_5 = arith.constant dense<0xFF800000> : vector<256xf32>
    %9 = vector.multi_reduction <maximumf>, %8, %cst_5 [0] : vector<128x256xf32> to vector<256xf32>
    %10 = vector.shape_cast %9 : vector<256xf32> to vector<1x256xf32>
    %11 = vector.broadcast %10 : vector<1x256xf32> to vector<128x256xf32>
    %12 = arith.cmpf oeq, %8, %11 : vector<128x256xf32>
    %c128_i32 = arith.constant 128 : i32
    %13 = vector.broadcast %c128_i32 : i32 to vector<128x256xi32>
    %14 = arith.select %12, %4, %13 : vector<128x256xi1>, vector<128x256xi32>
    %cst_6 = arith.constant dense<2147483647> : vector<256xi32>
    %15 = vector.multi_reduction <minsi>, %14, %cst_6 [0] : vector<128x256xi32> to vector<256xi32>
    %16 = vector.shape_cast %15 : vector<256xi32> to vector<1x256xi32>
    %17 = vector.broadcast %16 : vector<1x256xi32> to vector<128x256xi32>
    %18 = arith.cmpi eq, %4, %17 : vector<128x256xi32>
    %19 = arith.extui %18 : vector<128x256xi1> to vector<128x256xi32>
    %20 = arith.sitofp %19 : vector<128x256xi32> to vector<128x256xf32>
    %c0_7 = arith.constant 0 : index
    %c0_8 = arith.constant 0 : index
    %21 = vector.load %arg4[%c0_7, %c0_8] : memref<128x128xf32, #tpu.memory_space<vmem>>, vector<128x128xf32>
    %cst_9 = arith.constant dense<0.000000e+00> : vector<128x256xf32>
    %22 = tpu.matmul %21, %20, %cst_9 {dimension_numbers = #tpu.dot_dimension_numbers<[1], [0], [0], [1], [0, 0, 1, 1], [], []>} : vector<128x128xf32>, vector<128x256xf32>, vector<128x256xf32> -> vector<128x256xf32>
    %c0_10 = arith.constant 0 : index
    %c0_11 = arith.constant 0 : index
    %c0_12 = arith.constant 0 : index
    %23 = vector.load %arg5[%c0_10, %c0_11, %c0_12] : memref<1x128x256xf32, #tpu.memory_space<vmem>>, vector<1x128x256xf32>
    %24 = vector.shape_cast %23 : vector<1x128x256xf32> to vector<128x256xf32>
    %25 = vector.shape_cast %22 : vector<128x256xf32> to vector<1x128x256xf32>
    tpu.vector_store %arg5[%c0_10, %c0_11, %c0_12], %25 {strides = array<i32>} : memref<1x128x256xf32, #tpu.memory_space<vmem>>, vector<1x128x256xf32>,
    return
  }
  func.func @transform_0(%arg0: i32, %arg1: i32) -> (i32, i32, i32) {
    %c0_i32 = arith.constant 0 : i32
    %c0_i32_0 = arith.constant 0 : i32
    return %arg0, %c0_i32, %arg1 : i32, i32, i32
  }
  func.func @transform_1(%arg0: i32, %arg1: i32) -> (i32, i32) {
    %c0_i32 = arith.constant 0 : i32
    %c0_i32_0 = arith.constant 0 : i32
    %c0_i32_1 = arith.constant 0 : i32
    return %c0_i32, %c0_i32_0 : i32, i32
  }
  func.func @transform_2(%arg0: i32, %arg1: i32) -> (i32, i32) {
    %c0_i32 = arith.constant 0 : i32
    %c0_i32_0 = arith.constant 0 : i32
    %c0_i32_1 = arith.constant 0 : i32
    return %c0_i32, %c0_i32_0 : i32, i32
  }
  func.func @transform_3(%arg0: i32, %arg1: i32) -> (i32, i32, i32) {
    %c0_i32 = arith.constant 0 : i32
    %c0_i32_0 = arith.constant 0 : i32
    return %arg0, %c0_i32, %arg1 : i32, i32, i32
  }
}

</mosaic_0001>

<bundles_post_ra>
// kernel: tpu_custom_call.1
= control target key start
LH: loop header
LB: loop body
LE: loop exit
PB: predicated region body
PF: predicated region fallthrough
CT: control target
= control target key end

     0   :  { %8 = vsyncpa [#allocation3], 0  ;;  %s2291_s0 = inlined_call_operand.hbm [shape: f32[2,128,256], index: 0, kind: input, shape index: {}]   ;;  %s2292_s1 = inlined_call_operand.hbm [shape: f32[128,128], index: 1, kind: input, shape index: {}]   ;;  %s2293_s2 = inlined_call_operand.hbm [shape: f32[128,128], index: 2, kind: input, shape index: {}]   ;;  %s2294_s3 = inlined_call_operand.hbm [shape: f32[2,128,256], index: 3, kind: output, shape index: {}]  }
   0x1   :  { %10 = vsyncpa [#allocation3 + $0x1], 0 }
   0x2   :  { %11 = vsyncpa [#allocation6], 0 }
   0x3   :  { %12 = vsyncpa [#allocation4], 0 }
   0x4   :  { %14 = vsyncpa [#allocation4 + $0x1], 0  ;;  %s1575_s12 = smov 0   ;;  %s1577_s13 = smov 0  }
   0x5   :  { %s1579_s14 = smov 0   ;;  %s1581_s15 = smov 0  }
   0x6   :  { %s1583_s16 = smov 0   ;;  %s1585_s17 = smov 0  }
   0x7 LB: > { %s1123_s18 = sadd.s32 4294967295, %s1541_s17   ;;  %s1124_s19 = sadd.s32 4294967294, %s1541_s17   ;;  %s1541_s17 = sphi %s1585_s17, %s20_s17   ;;  %s1537_s16 = sphi %s1583_s16, %s2320_s16   ;;  %s1533_s15 = sphi %s1581_s15, %s2319_s15   ;;  %s1529_s14 = sphi %s1579_s14, %s2318_s14   ;;  %s1525_s13 = sphi %s1577_s13, %s2317_s13   ;;  %s1521_s12 = sphi %s1575_s12, %s2316_s12  }
   0x8   : > { %p54_p0 = scmp.ne.s32.totalorder %s1525_s13, %s1521_s12  ;;  %p1609_p1 = scmp.eq.s32.totalorder %s1123_s18, 0 }
   0x9   : > { %p1613_p2 = scmp.eq.s32.totalorder %s1123_s18, 1  ;;  %p128_p3 = scmp.eq.s32.totalorder %s1124_s19, 1 }
   0xa   : > { %s2299_s20 = scalar_select %p1609_p1, 1, 0 }
   0xb   : > { %p1619_p4 = por %p1609_p1, %p54_p0  ;;  %p1125_p5 = scmp.ge.s32.totalorder %s1541_s17, 1 }
   0xc   : > { %p1624_p6 = por %p128_p3, %p54_p0  ;;  %p135_p7 = scmp.lt.s32.totalorder %s1541_s17, 3 }
   0xd   : > { %s2301_s22 = scalar_select %p1619_p4, 1, 0 }
   0xe   : > { %s2302_s23 = scalar_select %p1624_p6, 1, 0 }
   0xf   : > { %p1629_p8 = pnand %p1125_p5, %p135_p7  ;;  %s1543_s25 = smov [#allocation5]  }
  0x10   : > { %s147_s26 = sshll.u32 %s1543_s25, 4  ;;  %s1544_s28 = smov [#allocation7]   ;;  %s1633_s26 = int_to_ptr.vmem [resolvable:$true] %s147_s26 }
  0x11   : > { %p1290_p9 = pneg %p1629_p8  ;;  %s160_s29 = sshll.u32 %s1544_s28, 4  ;;  %s1644_s29 = int_to_ptr.vmem [resolvable:$true] %s160_s29 }
  0x12   : > { %s1369_s5 = scalar_lea.hbm %s2292_s1, 2048 }
  0x13   : > { %p1640_p11 = pnand %p1290_p9, %p1609_p1  ;;  %p1370_p12 = scmp.ne.s32.totalorder %s2292_s1, %s1369_s5 }
  0x14   : > { %p1376_p5 = scmp.lt.u32.totalorder %s1369_s5, %s2292_s1 }
  0x15   : > { %p1371_p13 = pneg %p1640_p11 }
  0x17   : > { %p1372_p0 = pnand %p1371_p13, %p1370_p12 }
  0x19   : > { %p1373_p3 = pneg %p1372_p0 }
  0x1b   : > { %p1378_p7 = pnand %p1376_p5, %p1373_p3 }
  0x1d   : > { %1381 = shalt.err (!%p1378_p7)
}
  0x1e   : > { %s1382_s10 = scalar_lea.vmem %s1633_s26, 2048  ;;  %p1390_p1 = scmp.lt.s32.totalorder %s1633_s26, %s1633_s26 }
  0x1f   : > { %p1383_p9 = scmp.ne.s32.totalorder %s1633_s26, %s1382_s10  ;;  %p1391_p12 = scmp.lt.s32.totalorder %s1382_s10, %s1382_s10 }
  0x21   : > { %p1385_p10 = pnand %p1383_p9, %p1371_p13  ;;  %p1392_p0 = por %p1391_p12, %p1390_p1 }
  0x23   : > { %p1386_p6 = pneg %p1385_p10 }
  0x25   : > { %p1393_p4 = pnand %p1392_p0, %p1386_p6 }
  0x27   : > { %1396 = shalt.err (!%p1393_p4)
}
  0x28   : > { %s1545_s11 = smov 128   ;;  %s1546_s18 = smov 8  }
  0x29   : > { %1293 = dma.hbm_to_vmem [thread:$0]  (!%p1640_p11), %s2292_s1, 2048, %s1633_s26, [#allocation6], %s1545_s11, %s1545_s11, %s1546_s18  }
  0x2a   : > { %s1397_s4 = scalar_lea.hbm %s2293_s2, 2048 }
  0x2b   : > { %p1398_p1 = scmp.ne.s32.totalorder %s2293_s2, %s1397_s4  ;;  %p1404_p10 = scmp.lt.u32.totalorder %s1397_s4, %s2293_s2 }
  0x2d   : > { %p1400_p4 = pnand %p1398_p1, %p1371_p13 }
  0x2f   : > { %p1401_p6 = pneg %p1400_p4 }
  0x31   : > { %p1406_p3 = pnand %p1404_p10, %p1401_p6 }
  0x33   : > { %1409 = shalt.err (!%p1406_p3)
}
  0x34   : > { %s1410_s26 = scalar_lea.vmem %s1644_s29, 2048  ;;  %p1418_p12 = scmp.lt.s32.totalorder %s1644_s29, %s1644_s29 }
  0x35   : > { %p1411_p5 = scmp.ne.s32.totalorder %s1644_s29, %s1410_s26  ;;  %p1419_p0 = scmp.lt.s32.totalorder %s1410_s26, %s1410_s26 }
  0x37   : > { %p1413_p7 = pnand %p1411_p5, %p1371_p13  ;;  %p1420_p1 = por %p1419_p0, %p1418_p12 }
  0x39   : > { %p1414_p9 = pneg %p1413_p7 }
  0x3b   : > { %p1421_p4 = pnand %p1420_p1, %p1414_p9 }
  0x3d   : > { %1424 = shalt.err (!%p1421_p4)
}
  0x3e   : > { %1296 = dma.hbm_to_vmem [thread:$0]  (!%p1640_p11), %s2293_s2, 2048, %s1644_s29, [#allocation6], %s1545_s11, %s1545_s11, %s1546_s18  }
  0x3f   : > { %s32_s19 = sadd.s32 1, %s1537_s16  ;;  %s41_s25 = sadd.s32 1, %s1529_s14 }
  0x40   : > { %p34_p13 = scmp.ge.s32.totalorder %s32_s19, 2  ;;  %p48_p6 = scmp.ne.s32.totalorder %s1529_s14, %s1525_s13 }
  0x41   : > { %p49_p10 = scmp.eq.s32.totalorder %s1541_s17, 0  ;;  %p1307_p3 = scmp.lt.s32.totalorder %s1541_s17, 2 }
  0x42   : > { %s2322_s19 = smov (%p34_p13, %s32_s19), 0  ;;  %p1708_p7 = por %p1613_p2, %p48_p6 }
  0x43   : > { %p50_p5 = por %p49_p10, %p48_p6  ;;  %s36_s28 = ssub.s32 %s1537_s16, %s2322_s19 }
  0x44   : > { %s2305_s27 = scalar_select %p1708_p7, 1, 0 }
  0x45   : > { %s174_s30 = sand.u32 1, %s1529_s14   ;;  %p39_p9 = scmp.eq.s32.totalorder %s36_s28, 0 }
  0x46   : > { %s1129_s29 = sshll.u32 %s174_s30, 8  ;;  %s1212_s11 = sshll.u32 %s1537_s16, 12 }
  0x47   : > { %s1717_s18 = scalar_select %p39_p9, %s1529_s14, %s41_s25  }
  0x48   : > { %s1722_s6 = scalar_lea.hbm %s2291_s0, %s1212_s11  ;;  %s178_s21 = scalar_lea.vmem [#allocation2], %s1129_s29 }
  0x49   : > { %s187_s7 = sshll.u32 %s178_s21, 4  ;;  %p1726_p2 = pnand %p1307_p3, %p50_p5  ;;  %s1730_s7 = int_to_ptr.vmem [resolvable:$true] %s187_s7 }
  0x4a   : > { %s1732_s26 = scalar_lea.sflag [#allocation3], %s174_s30  ;;  %s1425_s9 = scalar_lea.hbm %s1722_s6, 4096 }
  0x4b   : > { %p1426_p11 = scmp.ne.s32.totalorder %s1722_s6, %s1425_s9  ;;  %p1427_p12 = pneg %p1726_p2 }
  0x4c   : > { %s1430_s28 = scalar_lea.hbm %s2291_s0, 8192  ;;  %p1431_p4 = scmp.lt.u32.totalorder %s1722_s6, %s2291_s0 }
  0x4d   : > { %p1428_p0 = pnand %p1427_p12, %p1426_p11  ;;  %p1432_p13 = scmp.lt.u32.totalorder %s1430_s28, %s1425_s9 }
  0x4e   : > { %p1434_p10 = scmp.lt.u32.totalorder %s1425_s9, %s1722_s6 }
  0x4f   : > { %p1429_p1 = pneg %p1428_p0  ;;  %p1433_p6 = por %p1432_p13, %p1431_p4 }
  0x51   : > { %p1435_p3 = por %p1434_p10, %p1433_p6 }
  0x53   : > { %p1436_p5 = pnand %p1435_p3, %p1429_p1 }
  0x55   : > { %1439 = shalt.err (!%p1436_p5)
}
  0x56   : > { %s1440_s30 = scalar_lea.vmem %s1730_s7, 4096  ;;  %s1547_s4 = smov [#allocation2]  }
  0x57   : > { %p1441_p9 = scmp.ne.s32.totalorder %s1730_s7, %s1440_s30  ;;  %s1445_s5 = sshll.u32 %s1547_s4, 4  ;;  %s1446_s5 = int_to_ptr.vmem [resolvable:$false] %s1445_s5 }
  0x58   : > { %s1447_s21 = scalar_lea.vmem %s1446_s5, 8192  ;;  %p1448_p7 = scmp.lt.s32.totalorder %s1730_s7, %s1446_s5 }
  0x59   : > { %p1443_p11 = pnand %p1441_p9, %p1427_p12  ;;  %p1449_p4 = scmp.lt.s32.totalorder %s1447_s21, %s1440_s30 }
  0x5b   : > { %p1444_p0 = pneg %p1443_p11  ;;  %p1450_p13 = por %p1449_p4, %p1448_p7 }
  0x5d   : > { %p1451_p6 = pnand %p1450_p13, %p1444_p0 }
  0x5f   : > { %1454 = shalt.err (!%p1451_p6)
}
  0x60   : > { %s1548_s9 = smov 256   ;;  %s1549_s10 = smov 16  }
  0x61   : > { %1300 = dma.hbm_to_vmem [thread:$0]  (!%p1726_p2), %s1722_s6, 4096, %s1730_s7, %s1732_s26, %s1548_s9, %s1548_s9, %s1549_s10  }
  0x62   : > { %199 = sbr.rel (%p1629_p8) target bundleno = 790 (0x316), region = 32  ;;  %s1763_s25 = sand.u32 (!%p1629_p8), 1, %s1525_s13  }
  0x63   : > { %s1133_s28 = sshll.u32 (!%p1629_p8), %s1763_s25, 8  ;;  %s202_s29 = scalar_lea.sflag (!%p1629_p8), [#allocation3], %s1763_s25 }
  0x64   : > { %s1769_s11 = scalar_lea.vmem (!%p1629_p8), [#allocation2], %s1133_s28  ;;  %p2307_p7 = scmp.ne.s32.totalorder (!%p1629_p8), %s2301_s22, 0 }
  0x69   : > { %1508 = dma.done.wait (%p2307_p7), %s202_s29, 4096  }
  0x6a   : > { %1510 = vsyncadd (%p2307_p7), %s202_s29, 4294963200  ;;  %p2308_p2 = scmp.ne.s32.totalorder %s2299_s20, 0 }
  0x6c   : > { %1512 = dma.done.wait (%p2308_p2), [#allocation6], 4096  }
  0x6d   : > { %1514 = vsyncadd (%p2308_p2), [#allocation6], 4294963200  ;;  %v1550_v0 = vmov 0.0   ;;  %v239_v1 = vld [vmem:[%s1769_s11 + $0x8] sm:$0xff]  ;;  %v241_v2 = vld [vmem:[%s1769_s11 + $0x18] sm:$0xff]  ;;  %s2201_s20 = scalar_lea.vmem [#allocation8], %s1133_s28 }
  0x6e   : > { %350 = vmatprep.mubr.f32.mxu0 %v1550_v0  ;;  %872 = vmatprep.mubr.f32.mxu1 %v1550_v0  ;;  %v238_v3 = vld [vmem:[%s1769_s11] sm:$0xff]  ;;  %v1214_v4 = vpack.c.bf16 %v241_v2, %v239_v1  ;;  %v240_v5 = vld [vmem:[%s1769_s11 + $0x10] sm:$0xff]  ;;  %v243_v6 = vld [vmem:[%s1769_s11 + $0x28] sm:$0xff]  ;;  %s1213_s22 = sshll.u32 %s1533_s15, 12  ;;  %s1017_s24 = sshll.u32 %s2201_s20, 4  ;;  %s2240_s24 = int_to_ptr.vmem [resolvable:$true] %s1017_s24 }
  0x6f   : > { %v245_v7 = vld [vmem:[%s1769_s11 + $0x38] sm:$0xff]  ;;  %v1216_v8 = vpack.c.bf16 %v240_v5, %v238_v3  ;;  %v242_v10 = vld [vmem:[%s1769_s11 + $0x20] sm:$0xff]  ;;  %v244_v11 = vld [vmem:[%s1769_s11 + $0x30] sm:$0xff]  ;;  %s2238_s8 = scalar_lea.hbm %s2294_s3, %s1213_s22  ;;  %s1002_s26 = scalar_lea.sflag [#allocation4], %s1763_s25 }
  0x70   : > { %v1218_v9 = vpack.c.bf16 %v245_v7, %v243_v6  ;;  %v247_v12 = vld [vmem:[%s1769_s11 + $0x48] sm:$0xff]  ;;  %1215 = vmatprep.subr.bf16.mxu0 %v1214_v4  ;;  %v249_v13 = vld [vmem:[%s1769_s11 + $0x58] sm:$0xff]  ;;  %v1220_v14 = vpack.c.bf16 %v244_v11, %v242_v10  ;;  %v246_v16 = vld [vmem:[%s1769_s11 + $0x40] sm:$0xff]  ;;  %s1455_s15 = scalar_lea.vmem %s2240_s24, 4096  ;;  %p2313_p12 = scmp.ne.s32.totalorder %s2305_s27, 0 }
  0x71   : > { %1217 = vmatpush1.bf16.msra.mxu0 %v1216_v8  ;;  %v1222_v15 = vpack.c.bf16 %v249_v13, %v247_v12  ;;  %v248_v17 = vld [vmem:[%s1769_s11 + $0x50] sm:$0xff]  ;;  %v251_v18 = vld [vmem:[%s1769_s11 + $0x68] sm:$0xff]  ;;  %v253_v19 = vld [vmem:[%s1769_s11 + $0x78] sm:$0xff]  ;;  %p1456_p8 = scmp.ne.s32.totalorder %s2240_s24, %s1455_s15  ;;  %s1552_s30 = smov [#allocation8]  }
  0x72   : > { %1219 = vmatprep.subr.bf16.mxu0 %v1218_v9  ;;  %v1224_v20 = vpack.c.bf16 %v248_v17, %v246_v16  ;;  %v1226_v21 = vpack.c.bf16 %v253_v19, %v251_v18  ;;  %v250_v22 = vld [vmem:[%s1769_s11 + $0x60] sm:$0xff]  ;;  %v252_v23 = vld [vmem:[%s1769_s11 + $0x70] sm:$0xff]  ;;  %v255_v24 = vld [vmem:[%s1769_s11 + $0x88] sm:$0xff]  ;;  %s1459_s4 = sshll.u32 %s1552_s30, 4  ;;  %s1460_s4 = int_to_ptr.vmem [resolvable:$false] %s1459_s4 }
  0x73   : > { %v257_v25 = vld [vmem:[%s1769_s11 + $0x98] sm:$0xff]  ;;  %v1228_v26 = vpack.c.bf16 %v252_v23, %v250_v22  ;;  %v254_v28 = vld [vmem:[%s1769_s11 + $0x80] sm:$0xff]  ;;  %v256_v29 = vld [vmem:[%s1769_s11 + $0x90] sm:$0xff]  ;;  %p1457_p1 = pnand %p1456_p8, %p2313_p12  ;;  %s1461_s5 = scalar_lea.vmem %s1460_s4, 8192 }
  0x74   : > { %v1230_v27 = vpack.c.bf16 %v257_v25, %v255_v24  ;;  %v259_v30 = vld [vmem:[%s1769_s11 + $0xa8] sm:$0xff]  ;;  %v261_v31 = vld [vmem:[%s1769_s11 + $0xb8] sm:$0xff]  ;;  %v1232_v32 = vpack.c.bf16 %v256_v29, %v254_v28  ;;  %v258_v34 = vld [vmem:[%s1769_s11 + $0xa0] sm:$0xff]  ;;  %p1462_p3 = scmp.lt.s32.totalorder %s2240_s24, %s1460_s4  ;;  %p1463_p5 = scmp.lt.s32.totalorder %s1461_s5, %s1455_s15 }
  0x75   : > { %1221 = vmatpush1.bf16.msra.mxu0 %v1220_v14  ;;  %v1234_v33 = vpack.c.bf16 %v261_v31, %v259_v30  ;;  %v260_v35 = vld [vmem:[%s1769_s11 + $0xb0] sm:$0xff]  ;;  %v263_v36 = vld [vmem:[%s1769_s11 + $0xc8] sm:$0xff]  ;;  %v265_v37 = vld [vmem:[%s1769_s11 + $0xd8] sm:$0xff]  ;;  %v447_v31 = vlaneseq  ;;  %p1458_p10 = pneg %p1457_p1 }
  0x76   : > { %1223 = vmatprep.subr.bf16.mxu0 %v1222_v15  ;;  %v1236_v38 = vpack.c.bf16 %v260_v35, %v258_v34  ;;  %v1238_v39 = vpack.c.bf16 %v265_v37, %v263_v36  ;;  %v262_v40 = vld [vmem:[%s1769_s11 + $0xc0] sm:$0xff]  ;;  %v264_v41 = vld [vmem:[%s1769_s11 + $0xd0] sm:$0xff]  ;;  %v267_v42 = vld [vmem:[%s1769_s11 + $0xe8] sm:$0xff]  ;;  %p1464_p9 = por %p1463_p5, %p1462_p3 }
  0x77   : > { %v269_v43 = vld [vmem:[%s1769_s11 + $0xf8] sm:$0xff]  ;;  %v1240_v44 = vpack.c.bf16 %v264_v41, %v262_v40  ;;  %v266_v46 = vld [vmem:[%s1769_s11 + $0xe0] sm:$0xff]  ;;  %v268_v47 = vld [vmem:[%s1769_s11 + $0xf0] sm:$0xff]  ;;  %v1886_v36 = vshrl.u32 %v447_v31, 7 }
  0x78   : > { %v1242_v45 = vpack.c.bf16 %v269_v43, %v267_v42  ;;  %v1244_v48 = vpack.c.bf16 %v268_v47, %v266_v46  ;;  %v270_v49 = vld [vmem:[#allocation5] sm:$0xff]  ;;  %v271_v50 = vld [vmem:[#allocation5 + $0x8] sm:$0xff]  ;;  %v272_v51 = vld [vmem:[#allocation5 + $0x10] sm:$0xff]  ;;  %p1465_p11 = pnand %p1464_p9, %p1458_p10 }
  0x79   : > { %1225 = vmatpush1.bf16.msra.mxu0 %v1224_v20  ;;  %v273_v52 = vld [vmem:[#allocation5 + $0x18] sm:$0xff]  ;;  %v274_v53 = vld [vmem:[#allocation5 + $0x20] sm:$0xff]  ;;  %v275_v54 = vld [vmem:[#allocation5 + $0x28] sm:$0xff]  ;;  %v1895_v41 = vadd.s32 96, %v1886_v36  ;;  %v1970_v31 = vadd.s32 104, %v1886_v36 }
  0x7a   : > { %1227 = vmatprep.subr.bf16.mxu0 %v1226_v21  ;;  %v276_v55 = vld [vmem:[#allocation5 + $0x30] sm:$0xff]  ;;  %v277_v56 = vld [vmem:[#allocation5 + $0x38] sm:$0xff]  ;;  %v278_v57 = vld [vmem:[#allocation5 + $0x40] sm:$0xff] }
  0x7b   : > { %v279_v58 = vld [vmem:[#allocation5 + $0x48] sm:$0xff]  ;;  %v280_v59 = vld [vmem:[#allocation5 + $0x50] sm:$0xff]  ;;  %v281_v60 = vld [vmem:[#allocation5 + $0x58] sm:$0xff]  ;;  %vm476_vm0 = vcmp.lt.s32.totalorder %v1895_v41, 100 }
  0x7c   : > { %v282_v61 = vld [vmem:[#allocation5 + $0x60] sm:$0xff] }
  0x7d   : > { %1229 = vmatpush1.bf16.msra.mxu0 %v1228_v26 }
  0x7e   : > { %1231 = vmatprep.subr.bf16.mxu0 %v1230_v27 }
  0x81   : > { %1233 = vmatpush1.bf16.msra.mxu0 %v1232_v32 }
  0x82   : > { %1235 = vmatprep.subr.bf16.mxu0 %v1234_v33 }
  0x85   : > { %1237 = vmatpush1.bf16.msra.mxu0 %v1236_v38 }
  0x86   : > { %1239 = vmatprep.subr.bf16.mxu0 %v1238_v39 }
  0x89   : > { %1241 = vmatpush1.bf16.msra.mxu0 %v1240_v44 }
  0x8a   : > { %1243 = vmatprep.subr.bf16.mxu0 %v1242_v45 }
  0x8d   : > { %1245 = vmatpush1.bf16.msra.mxu0 %v1244_v48 }
  0x90   : > { %351 = vmatmul.mubr.f32.vlgmr.msra.gmra.mrb[0].mxu0 %v270_v49 }
  0x91   : > { %356 = vmatprep.mubr.f32.mxu0 %v1550_v0 }
  0x94   : > { %357 = vmatmul.mubr.f32.gmra.mrb[2].mxu0 %v271_v50 }
  0x95   : > { %362 = vmatprep.mubr.f32.mxu0 %v1550_v0 }
  0x98   : > { %363 = vmatmul.mubr.f32.gmra.mrb[4].mxu0 %v272_v51 }
  0x99   : > { %368 = vmatprep.mubr.f32.mxu0 %v1550_v0 }
  0x9c   : > { %369 = vmatmul.mubr.f32.gmra.mrb[6].mxu0 %v273_v52 }
  0x9d   : > { %374 = vmatprep.mubr.f32.mxu0 %v1550_v0 }
  0xa0   : > { %375 = vmatmul.mubr.f32.gmra.mrb[8].mxu0 %v274_v53 }
  0xa1   : > { %380 = vmatprep.mubr.f32.mxu0 %v1550_v0 }
  0xa4   : > { %381 = vmatmul.mubr.f32.gmra.mrb[10].mxu0 %v275_v54 }
  0xa5   : > { %386 = vmatprep.mubr.f32.mxu0 %v1550_v0 }
  0xa8   : > { %387 = vmatmul.mubr.f32.gmra.mrb[12].mxu0 %v276_v55 }
  0xa9   : > { %392 = vmatprep.mubr.f32.mxu0 %v1550_v0 }
  0xac   : > { %393 = vmatmul.mubr.f32.gmra.mrb[14].mxu0 %v277_v56 }
  0xad   : > { %398 = vmatprep.mubr.f32.mxu0 %v1550_v0 }
  0xb0   : > { %399 = vmatmul.mubr.f32.gmra.mrb[16].mxu0 %v278_v57 }
  0xb1   : > { %404 = vmatprep.mubr.f32.mxu0 %v1550_v0 }
  0xb4   : > { %405 = vmatmul.mubr.f32.gmra.mrb[18].mxu0 %v279_v58 }
  0xb5   : > { %410 = vmatprep.mubr.f32.mxu0 %v1550_v0 }
  0xb8   : > { %411 = vmatmul.mubr.f32.gmra.mrb[20].mxu0 %v280_v59 }
  0xb9   : > { %416 = vmatprep.mubr.f32.mxu0 %v1550_v0 }
  0xbc   : > { %417 = vmatmul.mubr.f32.gmra.mrb[22].mxu0 %v281_v60 }
  0xbd   : > { %422 = vmatprep.mubr.f32.mxu0 %v1550_v0 }
  0xc0   : > { %423 = vmatmul.mubr.f32.gmra.mrb[24].mxu0 %v282_v61 }
  0xc1   : > { %428 = vmatprep.mubr.f32.mxu0 %v1550_v0 }
 0x163   : > { %v1826_v62 = vpop.f32.mrb[0].mxu0 }
 0x164   : > { %v1828_v63 = vpop.f32.mrb[1].mxu0 }
 0x167   : > { %v1830_v1 = vpop.f32.mrb[2].mxu0 }
 0x168   : > { %v1832_v2 = vpop.f32.mrb[3].mxu0 }
 0x16b   : > { %v1834_v3 = vpop.f32.mrb[4].mxu0 }
 0x16c   : > { %v512_v4 = vmax.f32 %v1826_v62, %v1834_v3  ;;  %v1838_v5 = vpop.f32.mrb[5].mxu0 }
 0x16d   : > { %v533_v6 = vmax.f32 %v1828_v63, %v1838_v5 }
 0x16f   : > { %v1842_v7 = vpop.f32.mrb[6].mxu0 }
 0x170   : > { %v513_v8 = vmax.f32 %v1830_v1, %v1842_v7  ;;  %v1846_v9 = vpop.f32.mrb[7].mxu0 }
 0x171   : > { %v534_v10 = vmax.f32 %v1832_v2, %v1846_v9 }
 0x173   : > { %v1850_v11 = vpop.f32.mrb[8].mxu0 }
 0x174   : > { %v514_v12 = vmax.f32 %v512_v4, %v1850_v11  ;;  %v1853_v13 = vpop.f32.mrb[9].mxu0 }
 0x175   : > { %v535_v14 = vmax.f32 %v533_v6, %v1853_v13  ;;  %v1911_v6 = vadd.s32 8, %v1886_v36 }
 0x177   : > { %v1856_v15 = vpop.f32.mrb[10].mxu0 }
 0x178   : > { %v515_v16 = vmax.f32 %v513_v8, %v1856_v15  ;;  %v1859_v17 = vpop.f32.mrb[11].mxu0  ;;  %v1914_v8 = vadd.s32 16, %v1886_v36 }
 0x179   : > { %v536_v18 = vmax.f32 %v534_v10, %v1859_v17  ;;  %v1917_v10 = vadd.s32 24, %v1886_v36 }
 0x17b   : > { %v1862_v19 = vpop.f32.mrb[12].mxu0 }
 0x17c   : > { %v516_v20 = vmax.f32 %v514_v12, %v1862_v19  ;;  %v1865_v21 = vpop.f32.mrb[13].mxu0  ;;  %v1920_v12 = vadd.s32 32, %v1886_v36 }
 0x17d   : > { %v537_v22 = vmax.f32 %v535_v14, %v1865_v21  ;;  %v1923_v14 = vadd.s32 40, %v1886_v36 }
 0x17f   : > { %v1868_v23 = vpop.f32.mrb[14].mxu0 }
 0x180   : > { %v517_v24 = vmax.f32 %v515_v16, %v1868_v23  ;;  %v1871_v25 = vpop.f32.mrb[15].mxu0  ;;  %v1926_v16 = vadd.s32 48, %v1886_v36 }
 0x181   : > { %v538_v26 = vmax.f32 %v536_v18, %v1871_v25  ;;  %v1929_v18 = vadd.s32 56, %v1886_v36 }
 0x183   : > { %v1874_v27 = vpop.f32.mrb[16].mxu0 }
 0x184   : > { %v518_v28 = vmax.f32 %v516_v20, %v1874_v27  ;;  %v1877_v29 = vpop.f32.mrb[17].mxu0 }
 0x185   : > { %v539_v30 = vmax.f32 %v537_v22, %v1877_v29  ;;  %v1934_v22 = vadd.s32 64, %v1886_v36 }
 0x187   : > { %v1880_v32 = vpop.f32.mrb[18].mxu0 }
 0x188   : > { %v519_v33 = vmax.f32 %v517_v24, %v1880_v32  ;;  %v1883_v34 = vpop.f32.mrb[19].mxu0  ;;  %v1937_v24 = vadd.s32 72, %v1886_v36 }
 0x189   : > { %v540_v35 = vmax.f32 %v538_v26, %v1883_v34  ;;  %v1940_v26 = vadd.s32 80, %v1886_v36 }
 0x18b   : > { %v1888_v37 = vpop.f32.mrb[20].mxu0 }
 0x18c   : > { %v520_v38 = vmax.f32 %v518_v28, %v1888_v37  ;;  %v1891_v39 = vpop.f32.mrb[21].mxu0 }
 0x18d   : > { %v541_v40 = vmax.f32 %v539_v30, %v1891_v39  ;;  %v1967_v30 = vadd.s32 88, %v1886_v36 }
 0x18f   : > { %v1897_v42 = vpop.f32.mrb[22].mxu0 }
 0x190   : > { %v521_v43 = vmax.f32 %v519_v33, %v1897_v42  ;;  %v1900_v44 = vpop.f32.mrb[23].mxu0 }
 0x191   : > { %v542_v45 = vmax.f32 %v540_v35, %v1900_v44 }
 0x193   : > { %v424_v46 = vpop.f32.mrb[24].mxu0 }
 0x194   : > { %v1904_v47 = vsel %vm476_vm0, %v424_v46, -inf  ;;  %v426_v48 = vpop.f32.mrb[25].mxu0 }
 0x195   : > { %v522_v49 = vmax.f32 %v520_v38, %v1904_v47  ;;  %v1907_v50 = vsel %vm476_vm0, %v426_v48, -inf }
 0x196   : > { %v543_v51 = vmax.f32 %v541_v40, %v1907_v50 }
 0x197   : > { %v526_v52 = vmax.f32 %v522_v49, %v521_v43 }
 0x198   : > { %v547_v53 = vmax.f32 %v543_v51, %v542_v45  ;;  %v1993_v45 = vadd.s32 112, %v1886_v36 }
 0x199   : > { %v527_v54 = vrot.slane %v526_v52, 4 }
 0x19a   : > { %v548_v55 = vrot.slane %v547_v53, 4 }
 0x19b   : > { %v528_v56 = vmax.f32 %v526_v52, %v527_v54  ;;  %v284_v52 = vld [vmem:[#allocation5 + $0x70] sm:$0xff] }
 0x19c   : > { %v549_v57 = vmax.f32 %v547_v53, %v548_v55 }
 0x19d   : > { %v529_v58 = vrot.slane %v528_v56, 2 }
 0x19e   : > { %v550_v59 = vrot.slane %v549_v57, 2 }
 0x19f   : > { %v530_v60 = vmax.f32 %v528_v56, %v529_v58 }
 0x1a0   : > { %v551_v61 = vmax.f32 %v549_v57, %v550_v59  ;;  %v285_v59 = vld [vmem:[#allocation5 + $0x78] sm:$0xff] }
 0x1a1   : > { %v531_v4 = vrot.slane %v530_v60, 1 }
 0x1a2   : > { %v552_v28 = vrot.slane %v551_v61, 1 }
 0x1a3   : > { %v1931_v20 = vmax.f32 %v530_v60, %v531_v4 }
 0x1a4   : > { %v1974_v33 = vmax.f32 %v551_v61, %v552_v28 }
 0x1a5   : > { %vm554_vm1 = vcmp.eq.f32.partialorder %v1826_v62, %v1931_v20  ;;  %vm556_vm2 = vcmp.eq.f32.partialorder %v1830_v1, %v1931_v20  ;;  %vm558_vm3 = vcmp.eq.f32.partialorder %v1834_v3, %v1931_v20  ;;  %vm560_vm4 = vcmp.eq.f32.partialorder %v1842_v7, %v1931_v20 }
 0x1a6   : > { %vm562_vm5 = vcmp.eq.f32.partialorder %v1850_v11, %v1931_v20  ;;  %vm564_vm6 = vcmp.eq.f32.partialorder %v1856_v15, %v1931_v20  ;;  %vm566_vm7 = vcmp.eq.f32.partialorder %v1862_v19, %v1931_v20  ;;  %vm568_vm8 = vcmp.eq.f32.partialorder %v1868_v23, %v1931_v20 }
 0x1a7   : > { %vm570_vm9 = vcmp.eq.f32.partialorder %v1874_v27, %v1931_v20  ;;  %vm572_vm10 = vcmp.eq.f32.partialorder %v1880_v32, %v1931_v20  ;;  %vm574_vm11 = vcmp.eq.f32.partialorder %v1888_v37, %v1931_v20  ;;  %vm576_vm12 = vcmp.eq.f32.partialorder %v1897_v42, %v1931_v20  ;;  %v283_v27 = vld [vmem:[#allocation5 + $0x68] sm:$0xff] }
 0x1a8   : > { %vm578_vm13 = vcmp.eq.f32.partialorder %v1904_v47, %v1931_v20  ;;  %v586_v35 = vsel %vm554_vm1, %v1886_v36, 128  ;;  %v588_v38 = vsel %vm556_vm2, %v1911_v6, 128  ;;  %v590_v40 = vsel %vm558_vm3, %v1914_v8, 128  ;;  %429 = vmatmul.mubr.f32.gmra.mrb[26].mxu0 %v283_v27 }
 0x1a9   : > { %v592_v43 = vsel %vm560_vm4, %v1917_v10, 128  ;;  %v1996_v62 = vadd.s32 120, %v1886_v36  ;;  %vm1137_vm14 = vcmp.eq.f32.partialorder %v1931_v20, -inf  ;;  %v594_v1 = vsel %vm562_vm5, %v1920_v12, 128  ;;  %434 = vmatprep.mubr.f32.mxu0 %v1550_v0 }
 0x1aa   : > { %v596_v3 = vsel %vm564_vm6, %v1923_v14, 128  ;;  %v598_v7 = vsel %vm566_vm7, %v1926_v16, 128  ;;  %v600_v46 = vsel %vm568_vm8, %v1929_v18, 128  ;;  %v602_v11 = vsel %vm570_vm9, %v1934_v22, 128 }
 0x1ab   : > { %v604_v15 = vsel %vm572_vm10, %v1937_v24, 128  ;;  %v606_v19 = vsel %vm574_vm11, %v1940_v26, 128  ;;  %vm618_vm15 = vcmp.lt.s32.totalorder %v586_v35, %v590_v40  ;;  %vm620_vm0 = vcmp.lt.s32.totalorder %v588_v38, %v592_v43 }
 0x1ac   : > { %v619_v48 = vsel %vm618_vm15, %v586_v35, %v590_v40  ;;  %v621_v23 = vsel %vm620_vm0, %v588_v38, %v592_v43  ;;  %vm555_vm1 = vcmp.eq.f32.partialorder %v1828_v63, %v1974_v33  ;;  %vm557_vm2 = vcmp.eq.f32.partialorder %v1832_v2, %v1974_v33  ;;  %435 = vmatmul.mubr.f32.gmra.mrb[28].mxu0 %v284_v52 }
 0x1ad   : > { %vm622_vm3 = vcmp.lt.s32.totalorder %v619_v48, %v594_v1  ;;  %vm624_vm4 = vcmp.lt.s32.totalorder %v621_v23, %v596_v3  ;;  %vm559_vm5 = vcmp.eq.f32.partialorder %v1838_v5, %v1974_v33  ;;  %vm561_vm6 = vcmp.eq.f32.partialorder %v1846_v9, %v1974_v33  ;;  %440 = vmatprep.mubr.f32.mxu0 %v1550_v0 }
 0x1ae   : > { %v623_v32 = vsel %vm622_vm3, %v619_v48, %v594_v1  ;;  %v625_v37 = vsel %vm624_vm4, %v621_v23, %v596_v3  ;;  %vm569_vm15 = vcmp.eq.f32.partialorder %v1871_v25, %v1974_v33  ;;  %vm571_vm0 = vcmp.eq.f32.partialorder %v1877_v29, %v1974_v33 }
 0x1af   : > { %vm626_vm9 = vcmp.lt.s32.totalorder %v623_v32, %v598_v7  ;;  %vm628_vm10 = vcmp.lt.s32.totalorder %v625_v37, %v600_v46  ;;  %vm575_vm7 = vcmp.eq.f32.partialorder %v1891_v39, %v1974_v33  ;;  %vm577_vm11 = vcmp.eq.f32.partialorder %v1900_v44, %v1974_v33 }
 0x1b0   : > { %v627_v49 = vsel %vm626_vm9, %v623_v32, %v598_v7  ;;  %v629_v51 = vsel %vm628_vm10, %v625_v37, %v600_v46  ;;  %v608_v53 = vsel %vm576_vm12, %v1967_v30, 128  ;;  %vm579_vm9 = vcmp.eq.f32.partialorder %v1907_v50, %v1974_v33  ;;  %441 = vmatmul.mubr.f32.gmra.mrb[30].mxu0 %v285_v59 }
 0x1b1   : > { %vm630_vm4 = vcmp.lt.s32.totalorder %v627_v49, %v602_v11  ;;  %vm632_vm8 = vcmp.lt.s32.totalorder %v629_v51, %v604_v15  ;;  %v610_v56 = vsel %vm578_vm13, %v1895_v41, 128  ;;  %v612_v57 = vsel %vm1137_vm14, %v1970_v31, 128 }
 0x1b2   : > { %v631_v54 = vsel %vm630_vm4, %v627_v49, %v602_v11  ;;  %v633_v55 = vsel %vm632_vm8, %v629_v51, %v604_v15  ;;  %v614_v60 = vsel %vm1137_vm14, %v1993_v45, 128  ;;  %v616_v61 = vsel %vm1137_vm14, %v1996_v62, 128 }
 0x1b3   : > { %vm634_vm10 = vcmp.lt.s32.totalorder %v631_v54, %v606_v19  ;;  %vm636_vm3 = vcmp.lt.s32.totalorder %v633_v55, %v608_v53  ;;  %v587_v28 = vsel %vm555_vm1, %v1886_v36, 128  ;;  %v589_v35 = vsel %vm557_vm2, %v1911_v6, 128 }
 0x1b4   : > { %v635_v42 = vsel %vm634_vm10, %v631_v54, %v606_v19  ;;  %v637_v58 = vsel %vm636_vm3, %v633_v55, %v608_v53  ;;  %v591_v20 = vsel %vm559_vm5, %v1914_v8, 128  ;;  %v593_v38 = vsel %vm561_vm6, %v1917_v10, 128 }
 0x1b5   : > { %vm638_vm12 = vcmp.lt.s32.totalorder %v635_v42, %v610_v56  ;;  %vm640_vm8 = vcmp.lt.s32.totalorder %v637_v58, %v612_v57  ;;  %vm2309_vm1 = vcmp.eq.f32.partialorder %v1853_v13, %v1974_v33  ;;  %vm657_vm2 = vcmp.lt.s32.totalorder %v587_v28, %v591_v20 }
 0x1b6   : > { %v639_v47 = vsel %vm638_vm12, %v635_v42, %v610_v56  ;;  %v641_v4 = vsel %vm640_vm8, %v637_v58, %v612_v57  ;;  %v595_v2 = vsel %vm2309_vm1, %v1920_v12, 128  ;;  %vm659_vm4 = vcmp.lt.s32.totalorder %v589_v35, %v593_v38 }
 0x1b7   : > { %vm642_vm13 = vcmp.lt.s32.totalorder %v639_v47, %v614_v60  ;;  %vm644_vm3 = vcmp.lt.s32.totalorder %v641_v4, %v616_v61  ;;  %vm2310_vm5 = vcmp.eq.f32.partialorder %v1859_v17, %v1974_v33  ;;  %v658_v3 = vsel %vm657_vm2, %v587_v28, %v591_v20 }
 0x1b8   : > { %v643_v40 = vsel %vm642_vm13, %v639_v47, %v614_v60  ;;  %v645_v63 = vsel %vm644_vm3, %v641_v4, %v616_v61  ;;  %v597_v5 = vsel %vm2310_vm5, %v1923_v14, 128  ;;  %v660_v9 = vsel %vm659_vm4, %v589_v35, %v593_v38 }
 0x1b9   : > { %vm646_vm14 = vcmp.lt.s32.totalorder %v643_v40, %v645_v63  ;;  %vm2311_vm6 = vcmp.eq.f32.partialorder %v1865_v21, %v1974_v33  ;;  %vm661_vm10 = vcmp.lt.s32.totalorder %v658_v3, %v595_v2  ;;  %vm663_vm12 = vcmp.lt.s32.totalorder %v660_v9, %v597_v5 }
 0x1ba   : > { %v647_v43 = vsel %vm646_vm14, %v643_v40, %v645_v63  ;;  %v599_v7 = vsel %vm2311_vm6, %v1926_v16, 128  ;;  %v601_v13 = vsel %vm569_vm15, %v1929_v18, 128  ;;  %v662_v46 = vsel %vm661_vm10, %v658_v3, %v595_v2 }
 0x1bb   : > { %v648_v1 = vrot.slane %v647_v43, 4  ;;  %v664_v11 = vsel %vm663_vm12, %v660_v9, %v597_v5  ;;  %vm665_vm13 = vcmp.lt.s32.totalorder %v662_v46, %v599_v7  ;;  %v603_v17 = vsel %vm571_vm0, %v1934_v22, 128 }
 0x1bc   : > { %vm667_vm3 = vcmp.lt.s32.totalorder %v664_v11, %v601_v13  ;;  %vm2312_vm14 = vcmp.eq.f32.partialorder %v1883_v34, %v1974_v33  ;;  %v666_v19 = vsel %vm665_vm13, %v662_v46, %v599_v7  ;;  %vm1138_vm1 = vcmp.eq.f32.partialorder %v1974_v33, -inf }
 0x1bd   : > { %vm649_vm8 = vcmp.lt.s32.totalorder %v647_v43, %v648_v1  ;;  %v605_v21 = vsel %vm2312_vm14, %v1937_v24, 128  ;;  %v668_v48 = vsel %vm667_vm3, %v664_v11, %v601_v13  ;;  %v607_v25 = vsel %vm575_vm7, %v1940_v26, 128 }
 0x1be   : > { %v650_v15 = vsel %vm649_vm8, %v647_v43, %v648_v1  ;;  %vm669_vm15 = vcmp.lt.s32.totalorder %v666_v19, %v603_v17  ;;  %vm671_vm2 = vcmp.lt.s32.totalorder %v668_v48, %v605_v21  ;;  %v609_v29 = vsel %vm577_vm11, %v1967_v30, 128 }
 0x1bf   : > { %v651_v23 = vrot.slane %v650_v15, 2  ;;  %v670_v27 = vsel %vm669_vm15, %v666_v19, %v603_v17  ;;  %v672_v34 = vsel %vm671_vm2, %v668_v48, %v605_v21  ;;  %v611_v32 = vsel %vm579_vm9, %v1895_v41, 128 }
 0x1c0   : > { %vm673_vm0 = vcmp.lt.s32.totalorder %v670_v27, %v607_v25  ;;  %vm675_vm4 = vcmp.lt.s32.totalorder %v672_v34, %v609_v29  ;;  %v613_v39 = vsel %vm1138_vm1, %v1970_v31, 128  ;;  %v615_v44 = vsel %vm1138_vm1, %v1993_v45, 128 }
 0x1c1   : > { %v674_v37 = vsel %vm673_vm0, %v670_v27, %v607_v25  ;;  %v676_v49 = vsel %vm675_vm4, %v672_v34, %v609_v29  ;;  %vm652_vm5 = vcmp.lt.s32.totalorder %v650_v15, %v651_v23  ;;  %v617_v51 = vsel %vm1138_vm1, %v1996_v62, 128 }
 0x1c2   : > { %vm677_vm7 = vcmp.lt.s32.totalorder %v674_v37, %v611_v32  ;;  %vm679_vm11 = vcmp.lt.s32.totalorder %v676_v49, %v613_v39  ;;  %v653_v55 = vsel %vm652_vm5, %v650_v15, %v651_v23  ;;  %v1551_v4 = vmov 1.0|1.0  }
 0x1c3   : > { %v678_v52 = vsel %vm677_vm7, %v674_v37, %v611_v32  ;;  %v680_v50 = vsel %vm679_vm11, %v676_v49, %v613_v39  ;;  %v654_v42 = vrot.slane %v653_v55, 1 }
 0x1c4   : > { %vm681_vm9 = vcmp.lt.s32.totalorder %v678_v52, %v615_v44  ;;  %vm683_vm6 = vcmp.lt.s32.totalorder %v680_v50, %v617_v51 }
 0x1c5   : > { %v682_v53 = vsel %vm681_vm9, %v678_v52, %v615_v44  ;;  %v684_v54 = vsel %vm683_vm6, %v680_v50, %v617_v51  ;;  %vm655_vm8 = vcmp.lt.s32.totalorder %v653_v55, %v654_v42 }
 0x1c6   : > { %vm685_vm10 = vcmp.lt.s32.totalorder %v682_v53, %v684_v54  ;;  %v2134_v61 = vsel %vm655_vm8, %v653_v55, %v654_v42 }
 0x1c7   : > { %v686_v56 = vsel %vm685_vm10, %v682_v53, %v684_v54  ;;  %vm696_vm14 = vcmp.eq.s32.totalorder %v1886_v36, %v2134_v61  ;;  %vm698_vm1 = vcmp.eq.s32.totalorder %v1911_v6, %v2134_v61  ;;  %vm700_vm9 = vcmp.eq.s32.totalorder %v1914_v8, %v2134_v61 }
 0x1c8   : > { %v687_v57 = vrot.slane %v686_v56, 4  ;;  %vm1248_vm11 = vmpackc.low %vm698_vm1, %vm696_vm14  ;;  %vm702_vm6 = vcmp.eq.s32.totalorder %v1917_v10, %v2134_v61  ;;  %vm706_vm14 = vcmp.eq.s32.totalorder %v1923_v14, %v2134_v61 }
 0x1c9   : > { %vm1252_vm8 = vmpackc.low %vm702_vm6, %vm700_vm9 }
 0x1ca   : > { %vm688_vm12 = vcmp.lt.s32.totalorder %v686_v56, %v687_v57 }
 0x1cb   : > { %v689_v58 = vsel %vm688_vm12, %v686_v56, %v687_v57 }
 0x1cc   : > { %v690_v59 = vrot.slane %v689_v58, 2 }
 0x1ce   : > { %vm691_vm13 = vcmp.lt.s32.totalorder %v689_v58, %v690_v59 }
 0x1cf   : > { %v692_v60 = vsel %vm691_vm13, %v689_v58, %v690_v59 }
 0x1d0   : > { %v693_v33 = vrot.slane %v692_v60, 1 }
 0x1d2   : > { %vm694_vm3 = vcmp.lt.s32.totalorder %v692_v60, %v693_v33 }
 0x1d3   : > { %v695_v47 = vsel %vm694_vm3, %v692_v60, %v693_v33  ;;  %vm704_vm3 = vcmp.eq.s32.totalorder %v1920_v12, %v2134_v61 }
 0x1d4   : > { %vm697_vm15 = vcmp.eq.s32.totalorder %v1886_v36, %v695_v47  ;;  %vm699_vm2 = vcmp.eq.s32.totalorder %v1911_v6, %v695_v47  ;;  %vm701_vm0 = vcmp.eq.s32.totalorder %v1914_v8, %v695_v47  ;;  %vm703_vm4 = vcmp.eq.s32.totalorder %v1917_v10, %v695_v47  ;;  %v792_v36 = vld [vmem:[#allocation7] sm:$0xff]  ;;  %v794_v6 = vld [vmem:[#allocation7 + $0x10] sm:$0xff]  ;;  %v795_v8 = vld [vmem:[#allocation7 + $0x18] sm:$0xff] }
 0x1d5   : > { %vm1246_vm7 = vmpackc.low %vm699_vm2, %vm697_vm15  ;;  %vm705_vm10 = vcmp.eq.s32.totalorder %v1920_v12, %v695_v47  ;;  %vm707_vm12 = vcmp.eq.s32.totalorder %v1923_v14, %v695_v47  ;;  %vm709_vm1 = vcmp.eq.s32.totalorder %v1926_v16, %v695_v47  ;;  %vm711_vm15 = vcmp.eq.s32.totalorder %v1929_v18, %v695_v47  ;;  %v796_v10 = vld [vmem:[#allocation7 + $0x20] sm:$0xff]  ;;  %v797_v12 = vld [vmem:[#allocation7 + $0x28] sm:$0xff] }
 0x1d6   : > { %1247 = vmatprep.subr.msk.bf16.mxu1 %vm1246_vm7, %v1551_v4  ;;  %vm1250_vm5 = vmpackc.low %vm703_vm4, %vm701_vm0  ;;  %vm708_vm4 = vcmp.eq.s32.totalorder %v1926_v16, %v2134_v61  ;;  %vm710_vm7 = vcmp.eq.s32.totalorder %v1929_v18, %v2134_v61  ;;  %v798_v14 = vld [vmem:[#allocation7 + $0x30] sm:$0xff]  ;;  %v799_v16 = vld [vmem:[#allocation7 + $0x38] sm:$0xff] }
 0x1d7   : > { %1249 = vmatpush1.bf16.msk.msra.mxu1 %vm1248_vm11, %v1551_v4  ;;  %vm1254_vm13 = vmpackc.low %vm707_vm12, %vm705_vm10  ;;  %vm713_vm11 = vcmp.eq.s32.totalorder %v1934_v22, %v695_v47  ;;  %vm712_vm10 = vcmp.eq.s32.totalorder %v1934_v22, %v2134_v61  ;;  %vm714_vm12 = vcmp.eq.s32.totalorder %v1937_v24, %v2134_v61  ;;  %v800_v18 = vld [vmem:[#allocation7 + $0x40] sm:$0xff]  ;;  %v801_v22 = vld [vmem:[#allocation7 + $0x48] sm:$0xff] }
 0x1d8   : > { %1251 = vmatprep.subr.msk.bf16.mxu1 %vm1250_vm5, %v1551_v4  ;;  %vm1256_vm2 = vmpackc.low %vm706_vm14, %vm704_vm3  ;;  %vm715_vm5 = vcmp.eq.s32.totalorder %v1937_v24, %v695_v47  ;;  %v802_v24 = vld [vmem:[#allocation7 + $0x50] sm:$0xff] }
 0x1d9   : > { %vm1258_vm0 = vmpackc.low %vm711_vm15, %vm709_vm1  ;;  %vm716_vm1 = vcmp.eq.s32.totalorder %v1940_v26, %v2134_v61  ;;  %vm718_vm15 = vcmp.eq.s32.totalorder %v1967_v30, %v2134_v61 }
 0x1da   : > { %vm1260_vm9 = vmpackc.low %vm710_vm7, %vm708_vm4 }
 0x1db   : > { %1253 = vmatpush1.bf16.msk.msra.mxu1 %vm1252_vm8, %v1551_v4  ;;  %vm1262_vm6 = vmpackc.low %vm715_vm5, %vm713_vm11  ;;  %vm717_vm8 = vcmp.eq.s32.totalorder %v1940_v26, %v695_v47  ;;  %vm720_vm11 = vcmp.eq.s32.totalorder %v1895_v41, %v2134_v61  ;;  %vm722_vm5 = vcmp.eq.s32.totalorder %v1970_v31, %v2134_v61  ;;  %v803_v26 = vld [vmem:[#allocation7 + $0x58] sm:$0xff] }
 0x1dc   : > { %1255 = vmatprep.subr.msk.bf16.mxu1 %vm1254_vm13, %v1551_v4  ;;  %vm719_vm13 = vcmp.eq.s32.totalorder %v1967_v30, %v695_v47  ;;  %vm1264_vm3 = vmpackc.low %vm714_vm12, %vm712_vm10  ;;  %v804_v30 = vld [vmem:[#allocation7 + $0x60] sm:$0xff] }
 0x1dd   : > { %vm1266_vm14 = vmpackc.low %vm719_vm13, %vm717_vm8  ;;  %vm724_vm8 = vcmp.eq.s32.totalorder %v1993_v45, %v2134_v61  ;;  %vm726_vm13 = vcmp.eq.s32.totalorder %v1996_v62, %v2134_v61 }
 0x1de   : > { %vm1268_vm4 = vmpackc.low %vm718_vm15, %vm716_vm1 }
 0x1df   : > { %1257 = vmatpush1.bf16.msk.msra.mxu1 %vm1256_vm2, %v1551_v4  ;;  %vm721_vm2 = vcmp.eq.s32.totalorder %v1895_v41, %v695_v47  ;;  %vm1272_vm10 = vmpackc.low %vm722_vm5, %vm720_vm11  ;;  %v793_v41 = vld [vmem:[#allocation7 + $0x8] sm:$0xff] }
 0x1e0   : > { %1259 = vmatprep.subr.msk.bf16.mxu1 %vm1258_vm0, %v1551_v4  ;;  %vm723_vm0 = vcmp.eq.s32.totalorder %v1970_v31, %v695_v47  ;;  %v805_v31 = vld [vmem:[#allocation7 + $0x68] sm:$0xff] }
 0x1e1   : > { %vm1270_vm7 = vmpackc.low %vm723_vm0, %vm721_vm2 }
 0x1e3   : > { %1261 = vmatpush1.bf16.msk.msra.mxu1 %vm1260_vm9, %v1551_v4  ;;  %vm725_vm9 = vcmp.eq.s32.totalorder %v1993_v45, %v695_v47  ;;  %v806_v45 = vld [vmem:[#allocation7 + $0x70] sm:$0xff] }
 0x1e4   : > { %1263 = vmatprep.subr.msk.bf16.mxu1 %vm1262_vm6, %v1551_v4  ;;  %vm727_vm6 = vcmp.eq.s32.totalorder %v1996_v62, %v695_v47  ;;  %v807_v62 = vld [vmem:[#allocation7 + $0x78] sm:$0xff] }
 0x1e5   : > { %vm1274_vm12 = vmpackc.low %vm727_vm6, %vm725_vm9 }
 0x1e7   : > { %1265 = vmatpush1.bf16.msk.msra.mxu1 %vm1264_vm3, %v1551_v4  ;;  %vm1276_vm3 = vmpackc.low %vm726_vm13, %vm724_vm8 }
 0x1e8   : > { %1267 = vmatprep.subr.msk.bf16.mxu1 %vm1266_vm14, %v1551_v4 }
 0x1eb   : > { %1269 = vmatpush1.bf16.msk.msra.mxu1 %vm1268_vm4, %v1551_v4 }
 0x1ec   : > { %1271 = vmatprep.subr.msk.bf16.mxu1 %vm1270_vm7, %v1551_v4 }
 0x1ef   : > { %1273 = vmatpush1.bf16.msk.msra.mxu1 %vm1272_vm10, %v1551_v4 }
 0x1f0   : > { %1275 = vmatprep.subr.msk.bf16.mxu1 %vm1274_vm12, %v1551_v4 }
 0x1f3   : > { %1277 = vmatpush1.bf16.msk.msra.mxu1 %vm1276_vm3, %v1551_v4 }
 0x1f6   : > { %873 = vmatmul.mubr.f32.vlgmr.msra.gmra.mrb[0].mxu1 %v792_v36 }
 0x1f7   : > { %878 = vmatprep.mubr.f32.mxu1 %v1550_v0 }
 0x1fa   : > { %879 = vmatmul.mubr.f32.gmra.mrb[2].mxu1 %v793_v41 }
 0x1fb   : > { %884 = vmatprep.mubr.f32.mxu1 %v1550_v0 }
 0x1fe   : > { %885 = vmatmul.mubr.f32.gmra.mrb[4].mxu1 %v794_v6 }
 0x1ff   : > { %890 = vmatprep.mubr.f32.mxu1 %v1550_v0 }
 0x202   : > { %891 = vmatmul.mubr.f32.gmra.mrb[6].mxu1 %v795_v8 }
 0x203   : > { %896 = vmatprep.mubr.f32.mxu1 %v1550_v0 }
 0x206   : > { %897 = vmatmul.mubr.f32.gmra.mrb[8].mxu1 %v796_v10 }
 0x207   : > { %902 = vmatprep.mubr.f32.mxu1 %v1550_v0 }
 0x20a   : > { %903 = vmatmul.mubr.f32.gmra.mrb[10].mxu1 %v797_v12 }
 0x20b   : > { %908 = vmatprep.mubr.f32.mxu1 %v1550_v0 }
 0x20e   : > { %909 = vmatmul.mubr.f32.gmra.mrb[12].mxu1 %v798_v14 }
 0x20f   : > { %914 = vmatprep.mubr.f32.mxu1 %v1550_v0 }
 0x212   : > { %915 = vmatmul.mubr.f32.gmra.mrb[14].mxu1 %v799_v16 }
 0x213   : > { %920 = vmatprep.mubr.f32.mxu1 %v1550_v0 }
 0x216   : > { %921 = vmatmul.mubr.f32.gmra.mrb[16].mxu1 %v800_v18 }
 0x217   : > { %926 = vmatprep.mubr.f32.mxu1 %v1550_v0 }
 0x21a   : > { %927 = vmatmul.mubr.f32.gmra.mrb[18].mxu1 %v801_v22 }
 0x21b   : > { %932 = vmatprep.mubr.f32.mxu1 %v1550_v0 }
 0x21e   : > { %933 = vmatmul.mubr.f32.gmra.mrb[20].mxu1 %v802_v24 }
 0x21f   : > { %938 = vmatprep.mubr.f32.mxu1 %v1550_v0 }
 0x222   : > { %939 = vmatmul.mubr.f32.gmra.mrb[22].mxu1 %v803_v26 }
 0x223   : > { %944 = vmatprep.mubr.f32.mxu1 %v1550_v0 }
 0x226   : > { %945 = vmatmul.mubr.f32.gmra.mrb[24].mxu1 %v804_v30 }
 0x227   : > { %950 = vmatprep.mubr.f32.mxu1 %v1550_v0 }
 0x22a   : > { %951 = vmatmul.mubr.f32.gmra.mrb[26].mxu1 %v805_v31 }
 0x22b   : > { %956 = vmatprep.mubr.f32.mxu1 %v1550_v0 }
 0x22e   : > { %957 = vmatmul.mubr.f32.gmra.mrb[28].mxu1 %v806_v45 }
 0x22f   : > { %962 = vmatprep.mubr.f32.mxu1 %v1550_v0 }
 0x232   : > { %963 = vmatmul.mubr.f32.gmra.mrb[30].mxu1 %v807_v62 }
 0x27b   : > { %v430_v28 = vpop.f32.mrb[26].mxu0 }
 0x27c   : > { %v432_v35 = vpop.f32.mrb[27].mxu0 }
 0x27f   : > { %v436_v20 = vpop.f32.mrb[28].mxu0 }
 0x280   : > { %v438_v38 = vpop.f32.mrb[29].mxu0 }
 0x283   : > { %v442_v40 = vpop.f32.mrb[30].mxu0 }
 0x284   : > { %v444_v63 = vpop.f32.mrb[31].mxu0 }
 0x2c9   : > { %v874_v43 = vpop.f32.mrb[0].mxu1 }
 0x2ca   : > { %969 = vst [vmem:[%s2201_s20] sm:$0xff] %v874_v43  ;;  %v876_v0 = vpop.f32.mrb[1].mxu1 }
 0x2cb   : > { %970 = vst [vmem:[%s2201_s20 + $0x8] sm:$0xff] %v876_v0 }
 0x2cd   : > { %v880_v2 = vpop.f32.mrb[2].mxu1 }
 0x2ce   : > { %971 = vst [vmem:[%s2201_s20 + $0x10] sm:$0xff] %v880_v2  ;;  %v882_v1 = vpop.f32.mrb[3].mxu1 }
 0x2cf   : > { %972 = vst [vmem:[%s2201_s20 + $0x18] sm:$0xff] %v882_v1 }
 0x2d1   : > { %v886_v5 = vpop.f32.mrb[4].mxu1 }
 0x2d2   : > { %973 = vst [vmem:[%s2201_s20 + $0x20] sm:$0xff] %v886_v5  ;;  %v888_v3 = vpop.f32.mrb[5].mxu1 }
 0x2d3   : > { %974 = vst [vmem:[%s2201_s20 + $0x28] sm:$0xff] %v888_v3 }
 0x2d5   : > { %v892_v9 = vpop.f32.mrb[6].mxu1 }
 0x2d6   : > { %975 = vst [vmem:[%s2201_s20 + $0x30] sm:$0xff] %v892_v9  ;;  %v894_v7 = vpop.f32.mrb[7].mxu1 }
 0x2d7   : > { %976 = vst [vmem:[%s2201_s20 + $0x38] sm:$0xff] %v894_v7 }
 0x2d9   : > { %v898_v13 = vpop.f32.mrb[8].mxu1 }
 0x2da   : > { %977 = vst [vmem:[%s2201_s20 + $0x40] sm:$0xff] %v898_v13  ;;  %v900_v46 = vpop.f32.mrb[9].mxu1 }
 0x2db   : > { %978 = vst [vmem:[%s2201_s20 + $0x48] sm:$0xff] %v900_v46 }
 0x2dd   : > { %v904_v11 = vpop.f32.mrb[10].mxu1 }
 0x2de   : > { %979 = vst [vmem:[%s2201_s20 + $0x50] sm:$0xff] %v904_v11  ;;  %v906_v15 = vpop.f32.mrb[11].mxu1 }
 0x2df   : > { %980 = vst [vmem:[%s2201_s20 + $0x58] sm:$0xff] %v906_v15 }
 0x2e1   : > { %v910_v17 = vpop.f32.mrb[12].mxu1 }
 0x2e2   : > { %981 = vst [vmem:[%s2201_s20 + $0x60] sm:$0xff] %v910_v17  ;;  %v912_v21 = vpop.f32.mrb[13].mxu1 }
 0x2e3   : > { %982 = vst [vmem:[%s2201_s20 + $0x68] sm:$0xff] %v912_v21 }
 0x2e5   : > { %v916_v19 = vpop.f32.mrb[14].mxu1 }
 0x2e6   : > { %983 = vst [vmem:[%s2201_s20 + $0x70] sm:$0xff] %v916_v19  ;;  %v918_v48 = vpop.f32.mrb[15].mxu1 }
 0x2e7   : > { %984 = vst [vmem:[%s2201_s20 + $0x78] sm:$0xff] %v918_v48 }
 0x2e9   : > { %v922_v25 = vpop.f32.mrb[16].mxu1 }
 0x2ea   : > { %985 = vst [vmem:[%s2201_s20 + $0x80] sm:$0xff] %v922_v25  ;;  %v924_v23 = vpop.f32.mrb[17].mxu1 }
 0x2eb   : > { %986 = vst [vmem:[%s2201_s20 + $0x88] sm:$0xff] %v924_v23 }
 0x2ed   : > { %v928_v29 = vpop.f32.mrb[18].mxu1 }
 0x2ee   : > { %987 = vst [vmem:[%s2201_s20 + $0x90] sm:$0xff] %v928_v29  ;;  %v930_v27 = vpop.f32.mrb[19].mxu1 }
 0x2ef   : > { %988 = vst [vmem:[%s2201_s20 + $0x98] sm:$0xff] %v930_v27 }
 0x2f1   : > { %v934_v34 = vpop.f32.mrb[20].mxu1 }
 0x2f2   : > { %989 = vst [vmem:[%s2201_s20 + $0xa0] sm:$0xff] %v934_v34  ;;  %v936_v32 = vpop.f32.mrb[21].mxu1 }
 0x2f3   : > { %990 = vst [vmem:[%s2201_s20 + $0xa8] sm:$0xff] %v936_v32 }
 0x2f5   : > { %v940_v39 = vpop.f32.mrb[22].mxu1 }
 0x2f6   : > { %991 = vst [vmem:[%s2201_s20 + $0xb0] sm:$0xff] %v940_v39  ;;  %v942_v37 = vpop.f32.mrb[23].mxu1 }
 0x2f7   : > { %992 = vst [vmem:[%s2201_s20 + $0xb8] sm:$0xff] %v942_v37 }
 0x2f9   : > { %v946_v49 = vpop.f32.mrb[24].mxu1 }
 0x2fa   : > { %993 = vst [vmem:[%s2201_s20 + $0xc0] sm:$0xff] %v946_v49  ;;  %v948_v44 = vpop.f32.mrb[25].mxu1 }
 0x2fb   : > { %994 = vst [vmem:[%s2201_s20 + $0xc8] sm:$0xff] %v948_v44 }
 0x2fd   : > { %v952_v51 = vpop.f32.mrb[26].mxu1 }
 0x2fe   : > { %995 = vst [vmem:[%s2201_s20 + $0xd0] sm:$0xff] %v952_v51  ;;  %v954_v52 = vpop.f32.mrb[27].mxu1 }
 0x2ff   : > { %996 = vst [vmem:[%s2201_s20 + $0xd8] sm:$0xff] %v954_v52 }
 0x301   : > { %v958_v50 = vpop.f32.mrb[28].mxu1 }
 0x302   : > { %997 = vst [vmem:[%s2201_s20 + $0xe0] sm:$0xff] %v958_v50  ;;  %v960_v53 = vpop.f32.mrb[29].mxu1 }
 0x303   : > { %998 = vst [vmem:[%s2201_s20 + $0xe8] sm:$0xff] %v960_v53 }
 0x305   : > { %v964_v54 = vpop.f32.mrb[30].mxu1 }
 0x306   : > { %999 = vst [vmem:[%s2201_s20 + $0xf0] sm:$0xff] %v964_v54  ;;  %v966_v55 = vpop.f32.mrb[31].mxu1 }
 0x307   : > { %1000 = vst [vmem:[%s2201_s20 + $0xf8] sm:$0xff] %v966_v55 }
 0x308   : > { %1468 = shalt.err (!%p1465_p11)
}
 0x309   : > { %s1469_s21 = scalar_lea.hbm %s2238_s8, 4096  ;;  %s1473_s28 = scalar_lea.hbm %s2294_s3, 8192 }
 0x30a   : > { %p1470_p0 = scmp.ne.s32.totalorder %s2238_s8, %s1469_s21  ;;  %p1474_p6 = scmp.lt.u32.totalorder %s2238_s8, %s2294_s3 }
 0x30b   : > { %p1475_p7 = scmp.lt.u32.totalorder %s1473_s28, %s1469_s21  ;;  %p1477_p8 = scmp.lt.u32.totalorder %s1469_s21, %s2238_s8 }
 0x30c   : > { %p1471_p4 = pnand %p1470_p0, %p2313_p12 }
 0x30d   : > { %p1476_p2 = por %p1475_p7, %p1474_p6 }
 0x30e   : > { %p1472_p13 = pneg %p1471_p4 }
 0x30f   : > { %p1478_p1 = por %p1477_p8, %p1476_p2 }
 0x311   : > { %p1479_p10 = pnand %p1478_p1, %p1472_p13 }
 0x313   : > { %1482 = shalt.err (!%p1479_p10)
}
 0x314   : > { %s1553_s20 = smov 256   ;;  %s1554_s22 = smov 16  }
 0x315   : > { %1288 = dma.vmem_to_hbm [thread:$0]  (%p2313_p12), %s2240_s24, 4096, %s2238_s8, %s1002_s26, %s1553_s20, %s1553_s20, %s1554_s22  }
 0x316 PF: > { %s1032_s6 = sand.u32 1, %s1521_s12   ;;  %p2314_p3 = scmp.ne.s32.totalorder %s2302_s23, 0 }
 0x317   : > { %p2315_p5 = scmp.ge.s32.totalorder %s1541_s17, 2  ;;  %s1033_s7 = scalar_lea.sflag [#allocation4], %s1032_s6 }
 0x319   : > { %p1302_p9 = pnand %p2315_p5, %p2314_p3 }
 0x31b   : > { %1516 = dma.done.wait (!%p1302_p9), %s1033_s7, 4096  }
 0x31c   : > { %1518 = vsyncadd (!%p1302_p9), %s1033_s7, 4294963200  ;;  %s20_s17 = sadd.s32 1, %s1541_s17   ;;  %s2316_s12 = smov %s1525_s13 }
 0x31d   : > { %p17_p11 = scmp.ge.s32.totalorder %s20_s17, 4   ;;  %s2317_s13 = smov %s1529_s14 }
 0x31e   : > { %s2318_s14 = smov %s1717_s18  ;;  %s2319_s15 = smov %s1537_s16 }
 0x31f   : > { %s2320_s16 = smov %s2322_s19  ;;  %19 = sbr.rel (!%p17_p11) target bundleno = 7 (0x7), region = 85 }
 0x326   :  { %1038 = vsyncpa [#allocation3], 1 }
 0x327   :  { %1040 = vsyncpa [#allocation3 + $0x1], 1 }
 0x328   :  { %1041 = vsyncpa [#allocation6], 1 }
 0x329   :  { %1042 = vsyncpa [#allocation4], 1 }
 0x32a   :  { %1044 = vsyncpa [#allocation4 + $0x1], 1 }

</bundles_post_ra>
